<compile_context>
chip_gen: v7x
topology: tpu7x:2x2x1
jax: 0.10.0
libtpu: 0.0.40
codegen_flags: <defaults>
</compile_context>

<pallas_src>
import functools

import jax
import jax.numpy as jnp
from jax import lax
from jax.experimental import pallas as pl
from jax.experimental.pallas import tpu as pltpu  # noqa: F401  (TPU backend)

# ----------------------------- config (small) -------------------------------
BATCH = 2
SEQ = 8
BERT_DIM = 32                    # config.bert_dim
REL_NUM = 4                      # config.rel_num
TAG_SIZE = 4                     # config.tag_size
PROJ_DIM = BERT_DIM * 3          # 96  (projection_matrix out features)
PROJ_PAD = 128                   # padded to a full lane tile
OUT_DIM = REL_NUM * TAG_SIZE     # 16
VOCAB = 50
VOCAB_PAD = 128                  # one-hot contraction dim padded to full lanes
BS = BATCH * SEQ                 # 16
SS = SEQ * SEQ                   # 64
BSS = BATCH * SEQ * SEQ          # 128

# TODO(synk): the pretrained pubmedbert 12-layer encoder is replaced by a
#             deterministic embedding-table lookup; the transformer stack is
#             not reproduced.
# TODO(synk): dropout / dropout_2 are identity (deterministic / eval-mode).


def _pair_dtype():
    """bf16 elementwise only where the VPU has bf16 VALUs (v6e/v7x)."""
    try:
        kind = jax.devices()[0].device_kind.lower()
    except Exception:
        return jnp.float32
    if any(v in kind for v in ("v2", "v3", "v4", "v5")):
        return jnp.float32
    return jnp.bfloat16


PAIR_DTYPE = _pair_dtype()


# ------------------------------ Pallas kernel --------------------------------
def rel_kernel(ids_ref, mask_ref, emb_ref, wcat_ref, bp_ref, wrt_ref, out_ref,
               *, train):
    """Fully fused RelModel scoring kernel (single invocation, no grid).

    ids_ref  : (B*S, 1)   int32  token ids
    mask_ref : (B*S, 1)   int32  attention mask (0/1)
    emb_ref  : (Vp, D)    bf16   zero-padded embedding table
    wcat_ref : (D, 2*Pp)  bf16   [:, :Pp] head-half proj W, [:, Pp:] tail-half
    bp_ref   : (1, Pp)    f32    projection bias; lane 96 == 1.0 (bias lane)
    wrt_ref  : train: (T*R, Pp) bf16  tag-major relation weights, col 96 == br
               eval : (T, R, Pp) bf16  same rows, split per tag
    out_ref  : train: (B, T*R, S*S) f32
               eval : (B, R,  S*S) int32  (argmax over the tag axis)
    """
    # ---- fused embedding lookup + mask (one-hot gather on the MXU) ----
    ids = ids_ref[...]                                                 # (BS, 1)
    msk = mask_ref[...]                                                # (BS, 1)
    vocab_iota = lax.broadcasted_iota(jnp.int32, (BS, VOCAB_PAD), 1)
    one_hot = ((vocab_iota == ids) & (msk > 0)).astype(jnp.bfloat16)   # (BS, Vp)
    enc = jnp.dot(one_hot, emb_ref[...],
                  preferred_element_type=jnp.float32).astype(jnp.bfloat16)  # (BS, D)

    # ---- fused head/tail projection (one matmul covers both halves) ----
    proj = jnp.dot(enc, wcat_ref[...],
                   preferred_element_type=jnp.float32)                 # (BS, 2*Pp)
    # Tile-aligned static slices; projection bias folded into the head half
    # (it distributes over the pair broadcast). Lane 96 of hp becomes exactly
    # 1.0 and carries the relation bias through the second matmul.
    hp = (proj[:, :PROJ_PAD] + bp_ref[...]).astype(PAIR_DTYPE)         # (BS, Pp)
    tp = proj[:, PROJ_PAD:].astype(PAIR_DTYPE)                         # (BS, Pp)

    # ---- entity-pair broadcast + ReLU ----
    pairs = (hp.reshape(BATCH, SEQ, 1, PROJ_PAD) +
             tp.reshape(BATCH, 1, SEQ, PROJ_PAD))                      # (B,S,S,Pp)
    ep = jnp.maximum(pairs, 0.0).reshape(BSS, PROJ_PAD).astype(jnp.bfloat16)

    def rel_scores(w):  # (rows, Pp) contracted with ep (BSS, Pp) -> (rows, BSS)
        return lax.dot_general(w, ep, (((1,), (1,)), ((), ())),
                               preferred_element_type=jnp.float32)

    if train:
        scores_t = rel_scores(wrt_ref[...])                            # (T*R, BSS)
        # Per-batch split so the wrapper only needs a free contiguous reshape
        # to (B, T, R, S, S).
        for b in range(BATCH):
            out_ref[b] = scores_t[:, b * SS:(b + 1) * SS]
    else:
        # Fused tag-axis argmax: one small matmul per tag, running compare /
        # select in f32 (strict '>' keeps the first max, matching argmax).
        best_val = rel_scores(wrt_ref[0])                              # (R, BSS)
        best_idx = jnp.zeros((REL_NUM, BSS), jnp.int32)
        for t in range(1, TAG_SIZE):
            cur = rel_scores(wrt_ref[t])
            take = cur > best_val
            best_val = jnp.where(take, cur, best_val)
            best_idx = jnp.where(take, jnp.int32(t), best_idx)
        for b in range(BATCH):
            out_ref[b] = best_idx[:, b * SS:(b + 1) * SS]


# ---------------------------- weight preparation ------------------------------
def prepare_kernel_weights(emb_table, wp, bp, wr, br):
    """One-time re-layout of PyTorch-format weights into kernel layout."""
    pad = PROJ_PAD - PROJ_DIM
    # Embedding table zero-padded to a full 128-lane contraction dim (bf16).
    emb = jnp.pad(emb_table, ((0, VOCAB_PAD - VOCAB), (0, 0))).astype(jnp.bfloat16)
    # projection_matrix: y = [head, tail] @ wp.T + bp  with wp: (3D, 2D)
    wph = jnp.pad(wp[:, :BERT_DIM].T, ((0, 0), (0, pad)))              # (D, Pp)
    wpt = jnp.pad(wp[:, BERT_DIM:].T, ((0, 0), (0, pad)))              # (D, Pp)
    wcat = jnp.concatenate([wph, wpt], axis=1).astype(jnp.bfloat16)    # (D, 2*Pp)
    # Bias lane: bp[96] = 1.0 so relu(hp + tp) holds an exact 1.0 there
    # (head/tail weight columns 96..127 are zero).
    bp_p = jnp.pad(bp, (0, pad)).at[PROJ_DIM].set(1.0)
    bp_p = bp_p.reshape(1, PROJ_PAD).astype(jnp.float32)
    # relation_matrix: scores = ep @ wr.T + br  with wr: (R*T, 3D), rel-major.
    # Re-order rows to tag-major (row = tag*R + rel) so the train output is a
    # plain reshape; fold br into padded column 96 (picked up by the 1.0 lane).
    wr_tm = wr.reshape(REL_NUM, TAG_SIZE, PROJ_DIM).transpose(1, 0, 2)
    wr_tm = wr_tm.reshape(OUT_DIM, PROJ_DIM)
    br_tm = br.reshape(REL_NUM, TAG_SIZE).T.reshape(OUT_DIM)
    wrt = jnp.pad(wr_tm, ((0, 0), (0, pad))).at[:, PROJ_DIM].set(br_tm)
    wrt = wrt.astype(jnp.bfloat16)                                     # (T*R, Pp)
    return dict(emb=emb, wcat=wcat, bp=bp_p,
                wrt=wrt,                                               # train layout
                wrt_tags=wrt.reshape(TAG_SIZE, REL_NUM, PROJ_PAD))     # eval layout


def init_params(key):
    ks = jax.random.split(key, 5)
    emb_table = jax.random.normal(ks[0], (VOCAB, BERT_DIM), jnp.float32) * 0.1
    wp = jax.random.normal(ks[1], (PROJ_DIM, 2 * BERT_DIM), jnp.float32) * 0.05
    bp = jax.random.normal(ks[2], (PROJ_DIM,), jnp.float32) * 0.05
    wr = jax.random.normal(ks[3], (OUT_DIM, PROJ_DIM), jnp.float32) * 0.05
    br = jax.random.normal(ks[4], (OUT_DIM,), jnp.float32) * 0.05
    return dict(emb_table=emb_table, wp=wp, bp=bp, wr=wr, br=br,
                kernel=prepare_kernel_weights(emb_table, wp, bp, wr, br))


# ------------------------------- model wrapper --------------------------------
def triple_score_matrix(token_ids, mask, kw, train=True):
    B, S = token_ids.shape
    ids2 = token_ids.reshape(B * S, 1).astype(jnp.int32)   # contiguous -> free
    msk2 = mask.reshape(B * S, 1).astype(jnp.int32)
    if train:
        out_shape = jax.ShapeDtypeStruct((B, OUT_DIM, S * S), jnp.float32)
        wrt = kw["wrt"]
    else:
        out_shape = jax.ShapeDtypeStruct((B, REL_NUM, S * S), jnp.int32)
        wrt = kw["wrt_tags"]
    out = pl.pallas_call(
        functools.partial(rel_kernel, train=train),
        out_shape=out_shape,
        # No grid / BlockSpecs: single invocation, every operand (< 64 KiB
        # total) fully resident in VMEM; no multi-core split at this size.
    )(ids2, msk2, kw["emb"], kw["wcat"], kw["bp"], wrt)
    if train:
        return out.reshape(B, TAG_SIZE, REL_NUM, S, S)      # contiguous -> free
    return out.reshape(B, REL_NUM, S, S)


def rel_model_forward(params, token_ids, mask, train=True):
    # get_encoded_text stand-in (embedding lookup + mask) is fused into the
    # kernel; self.dropout(encoded_text) is identity (deterministic).
    return triple_score_matrix(token_ids, mask, params["kernel"], train=train)


# ---------------- pure-JAX reference (matches the PyTorch code) ---------------
def reference_forward(params, token_ids, mask, train=True):
    enc = params["emb_table"][token_ids] * mask[..., None].astype(jnp.float32)
    B, S, D = enc.shape
    head = jnp.broadcast_to(enc[:, :, None, :], (B, S, S, D)).reshape(B, S * S, D)
    tail = jnp.tile(enc, (1, S, 1))
    pairs = jnp.concatenate([head, tail], axis=-1)
    pairs = pairs @ params["wp"].T + params["bp"]
    pairs = jnp.maximum(pairs, 0.0)
    scores = pairs @ params["wr"].T + params["br"]
    triple = scores.reshape(B, S, S, REL_NUM, TAG_SIZE)
    if train:
        return jnp.transpose(triple, (0, 4, 3, 1, 2))                 # (B,T,R,S,S)
    return jnp.transpose(jnp.argmax(triple, axis=-1), (0, 3, 1, 2))   # (B,R,S,S)


if __name__ == "__main__":
    key = jax.random.PRNGKey(0)
    pkey, dkey = jax.random.split(key)
    params = init_params(pkey)

    token_ids = jax.random.randint(dkey, (BATCH, SEQ), 0, VOCAB, jnp.int32)
    mask = jnp.ones((BATCH, SEQ), jnp.int32).at[:, -2:].set(0)

    fwd = jax.jit(rel_model_forward, static_argnames="train")

    # Train-mode path (full score tensor).
    out = jax.block_until_ready(fwd(params, token_ids, mask, train=True))
    ref = reference_forward(params, token_ids, mask, train=True)
    assert out.shape == (BATCH, TAG_SIZE, REL_NUM, SEQ, SEQ), out.shape
    # Kernel uses bf16 weights / (on v6e+) bf16 pair elementwise with f32 MXU
    # accumulation; compare against the f32 reference with a bf16 tolerance.
    max_err = float(jnp.max(jnp.abs(out - ref)))
    assert jnp.allclose(out, ref, atol=5e-3, rtol=3e-2), f"max abs err {max_err}"

    # Eval-mode path (tag-axis argmax fused in the kernel).
    out_eval = jax.block_until_ready(fwd(params, token_ids, mask, train=False))
    ref_eval = reference_forward(params, token_ids, mask, train=False)
    assert out_eval.shape == (BATCH, REL_NUM, SEQ, SEQ), out_eval.shape
    # bf16 can flip the argmax on near-ties; require near-total agreement.
    agree = float(jnp.mean((out_eval == ref_eval).astype(jnp.float32)))
    assert agree >= 0.9, f"eval argmax agreement {agree}"

    print("KERNEL_OK")
</pallas_src>

<mosaic_0001>
module attributes {stable_mosaic.version = 11 : i64} {
  func.func @rel_kernel(%arg0: memref<16x1xi32, #tpu.memory_space<vmem>>, %arg1: memref<16x1xi32, #tpu.memory_space<vmem>>, %arg2: memref<128x32xbf16, #tpu.memory_space<vmem>>, %arg3: memref<32x256xbf16, #tpu.memory_space<vmem>>, %arg4: memref<1x128xf32, #tpu.memory_space<vmem>>, %arg5: memref<16x128xbf16, #tpu.memory_space<vmem>>, %arg6: memref<2x16x64xf32, #tpu.memory_space<vmem>>) attributes {dimension_semantics = [], scalar_prefetch = 0 : i64, scratch_operands = 0 : i64, tpu.core_type = #tpu.core_type<tc>} {
    %c0 = arith.constant 0 : index
    %c0_0 = arith.constant 0 : index
    %0 = vector.load %arg0[%c0, %c0_0] : memref<16x1xi32, #tpu.memory_space<vmem>>, vector<16x1xi32>
    %c0_1 = arith.constant 0 : index
    %c0_2 = arith.constant 0 : index
    %1 = vector.load %arg1[%c0_1, %c0_2] : memref<16x1xi32, #tpu.memory_space<vmem>>, vector<16x1xi32>
    %2 = tpu.iota {dimensions = array<i32: 1>} : vector<16x128xi32>
    %3 = vector.broadcast %0 : vector<16x1xi32> to vector<16x128xi32>
    %4 = arith.cmpi eq, %2, %3 : vector<16x128xi32>
    %c0_i32 = arith.constant 0 : i32
    %5 = vector.broadcast %c0_i32 : i32 to vector<16x1xi32>
    %6 = arith.cmpi sgt, %1, %5 : vector<16x1xi32>
    %7 = vector.broadcast %6 : vector<16x1xi1> to vector<16x128xi1>
    %8 = arith.andi %4, %7 : vector<16x128xi1>
    %9 = arith.extui %8 : vector<16x128xi1> to vector<16x128xi32>
    %10 = arith.sitofp %9 : vector<16x128xi32> to vector<16x128xf32>
    %11 = arith.truncf %10 : vector<16x128xf32> to vector<16x128xbf16>
    %c0_3 = arith.constant 0 : index
    %c0_4 = arith.constant 0 : index
    %12 = vector.load %arg2[%c0_3, %c0_4] : memref<128x32xbf16, #tpu.memory_space<vmem>>, vector<128x32xbf16>
    %cst = arith.constant dense<0.000000e+00> : vector<16x32xf32>
    %13 = tpu.matmul %11, %12, %cst {dimension_numbers = #tpu.dot_dimension_numbers<[1], [0], [0], [1], [0, 0, 1, 1], [], []>} : vector<16x128xbf16>, vector<128x32xbf16>, vector<16x32xf32> -> vector<16x32xf32>
    %14 = arith.truncf %13 : vector<16x32xf32> to vector<16x32xbf16>
    %c0_5 = arith.constant 0 : index
    %c0_6 = arith.constant 0 : index
    %15 = vector.load %arg3[%c0_5, %c0_6] : memref<32x256xbf16, #tpu.memory_space<vmem>>, vector<32x256xbf16>
    %cst_7 = arith.constant dense<0.000000e+00> : vector<16x256xf32>
    %16 = tpu.matmul %14, %15, %cst_7 {dimension_numbers = #tpu.dot_dimension_numbers<[1], [0], [0], [1], [0, 0, 1, 1], [], []>} : vector<16x32xbf16>, vector<32x256xbf16>, vector<16x256xf32> -> vector<16x256xf32>
    %17 = vector.extract_strided_slice %16 {offsets = [0, 0], sizes = [16, 128], strides = [1, 1]} : vector<16x256xf32> to vector<16x128xf32>
    %c0_8 = arith.constant 0 : index
    %c0_9 = arith.constant 0 : index
    %18 = vector.load %arg4[%c0_8, %c0_9] : memref<1x128xf32, #tpu.memory_space<vmem>>, vector<1x128xf32>
    %19 = vector.broadcast %18 : vector<1x128xf32> to vector<16x128xf32>
    %20 = arith.addf %17, %19 : vector<16x128xf32>
    %21 = arith.truncf %20 : vector<16x128xf32> to vector<16x128xbf16>
    %22 = vector.extract_strided_slice %16 {offsets = [0, 128], sizes = [16, 128], strides = [1, 1]} : vector<16x256xf32> to vector<16x128xf32>
    %23 = arith.truncf %22 : vector<16x128xf32> to vector<16x128xbf16>
    %24 = vector.shape_cast %21 : vector<16x128xbf16> to vector<2x8x1x128xbf16>
    %25 = vector.shape_cast %23 : vector<16x128xbf16> to vector<2x1x8x128xbf16>
    %26 = vector.broadcast %24 : vector<2x8x1x128xbf16> to vector<2x8x8x128xbf16>
    %27 = vector.broadcast %25 : vector<2x1x8x128xbf16> to vector<2x8x8x128xbf16>
    %28 = arith.addf %26, %27 : vector<2x8x8x128xbf16>
    %cst_10 = arith.constant 0.000000e+00 : bf16
    %29 = vector.broadcast %cst_10 : bf16 to vector<2x8x8x128xbf16>
    %30 = arith.maximumf %28, %29 : vector<2x8x8x128xbf16>
    %31 = vector.shape_cast %30 : vector<2x8x8x128xbf16> to vector<128x128xbf16>
    %c0_11 = arith.constant 0 : index
    %c0_12 = arith.constant 0 : index
    %32 = vector.load %arg5[%c0_11, %c0_12] : memref<16x128xbf16, #tpu.memory_space<vmem>>, vector<16x128xbf16>
    %cst_13 = arith.constant dense<0.000000e+00> : vector<16x128xf32>
    %33 = tpu.matmul %32, %31, %cst_13 {dimension_numbers = #tpu.dot_dimension_numbers<[1], [1], [0], [0], [0, 0, 1, 0], [], []>} : vector<16x128xbf16>, vector<128x128xbf16>, vector<16x128xf32> -> vector<16x128xf32>
    %34 = vector.extract_strided_slice %33 {offsets = [0, 0], sizes = [16, 64], strides = [1, 1]} : vector<16x128xf32> to vector<16x64xf32>
    %c0_14 = arith.constant 0 : index
    %c0_15 = arith.constant 0 : index
    %c0_16 = arith.constant 0 : index
    %35 = vector.load %arg6[%c0_14, %c0_15, %c0_16] : memref<2x16x64xf32, #tpu.memory_space<vmem>>, vector<1x16x64xf32>
    %36 = vector.shape_cast %35 : vector<1x16x64xf32> to vector<16x64xf32>
    %37 = vector.shape_cast %34 : vector<16x64xf32> to vector<1x16x64xf32>
    tpu.vector_store %arg6[%c0_14, %c0_15, %c0_16], %37 {strides = array<i32>} : memref<2x16x64xf32, #tpu.memory_space<vmem>>, vector<1x16x64xf32>,
    %38 = vector.extract_strided_slice %33 {offsets = [0, 64], sizes = [16, 64], strides = [1, 1]} : vector<16x128xf32> to vector<16x64xf32>
    %c1 = arith.constant 1 : index
    %c0_17 = arith.constant 0 : index
    %c0_18 = arith.constant 0 : index
    %39 = vector.load %arg6[%c1, %c0_17, %c0_18] : memref<2x16x64xf32, #tpu.memory_space<vmem>>, vector<1x16x64xf32>
    %40 = vector.shape_cast %39 : vector<1x16x64xf32> to vector<16x64xf32>
    %41 = vector.shape_cast %38 : vector<16x64xf32> to vector<1x16x64xf32>
    tpu.vector_store %arg6[%c1, %c0_17, %c0_18], %41 {strides = array<i32>} : memref<2x16x64xf32, #tpu.memory_space<vmem>>, vector<1x16x64xf32>,
    return
  }
}

</mosaic_0001>

<bundles_post_ra>
// kernel: rel_model_forward.1
= control target key start
LH: loop header
LB: loop body
LE: loop exit
PB: predicated region body
PF: predicated region fallthrough
CT: control target
= control target key end

     0   :  { %v780_v0 = vmov 0   ;;  %v781_v4 = vmov 0.0   ;;  %vm782_vm2 = vmmov 0   ;;  %v28_v17 = vlaneseq  ;;  %s785_s30 = smov 64   ;;  %s1004_s0 = inlined_call_operand.vmem [shape: s32[16,1], index: 0, kind: input, shape index: {}]   ;;  %s1005_s1 = inlined_call_operand.vmem [shape: s32[16,1], index: 1, kind: input, shape index: {}]   ;;  %s1006_s2 = inlined_call_operand.vmem [shape: bf16[128,32], index: 2, kind: input, shape index: {}]   ;;  %s1007_s3 = inlined_call_operand.vmem [shape: bf16[32,256], index: 3, kind: input, shape index: {}]   ;;  %s1008_s5 = inlined_call_operand.vmem [shape: bf16[16,128], index: 5, kind: input, shape index: {}]   ;;  %s1009_s4 = inlined_call_operand.vmem [shape: f32[1,128], index: 4, kind: input, shape index: {}]   ;;  %s1010_s6 = inlined_call_operand.vmem [shape: f32[2,16,64], index: 6, kind: output, shape index: {}]  }
   0x1   :  { %763 = vset.pattern.permute.xlu0 %v780_v0  ;;  %v24_v1 = vld [vmem:[%s1004_s0] sm:$0xff]  ;;  %764 = vset.pattern.permute.xlu1 %v780_v0  ;;  %v27_v3 = vld [vmem:[%s1005_s1 + $0x8] sm:$0xff]  ;;  %v767_v10 = vld [vmem:[%s1006_s2 + $0x10] sm:$0xff]   ;;  %v783_v24 = vmov 1.0|1.0   ;;  %vm187_vm10 = vcmask 261120  }
   0x2   :  { %v26_v2 = vld [vmem:[%s1005_s1] sm:$0xff]  ;;  %31 = vperm.xlu0 %763, %v24_v1   ;;  %717 = vmatprep.subr.bf16.mxu0 %v781_v4  ;;  %v25_v6 = vld [vmem:[%s1004_s0 + $0x8] sm:$0xff]  ;;  %vm39_vm1 = vcmp.gt.s32.totalorder %v27_v3, 0  ;;  %v768_v11 = vld [vmem:[%s1006_s2 + $0x18] sm:$0xff]   ;;  %v29_v18 = vand.u32 127, %v28_v17  ;;  %v251_v35 = vshrl.u32 %v28_v17, 7 }
   0x3   :  { %vm38_vm0 = vcmp.gt.s32.totalorder %v26_v2, 0  ;;  %v765_v7 = vld [vmem:[%s1006_s2] sm:$0xff]   ;;  %737 = vmatprep.subr.bf16.mxu1 %v781_v4  ;;  %v41_v8 = vsel %vm39_vm1, 1, %v780_v0  ;;  %v766_v9 = vld [vmem:[%s1006_s2 + $0x8] sm:$0xff]   ;;  %733 = vmatprep.mubr.msk.bf16.mxu0 %vm782_vm2, %v781_v4  ;;  %v771_v14 = vld [vmem:[%s1006_s2 + $0x30] sm:$0xff]   ;;  %vm639_vm11 = vcmask 523264  }
   0x4   :  { %v40_v5 = vsel %vm38_vm0, 1, %v780_v0  ;;  %718 = vmatpush3.bf16.msra.mxu0 %v765_v7  ;;  %753 = vmatprep.mubr.msk.bf16.mxu1 %vm782_vm2, %v781_v4  ;;  %v769_v12 = vld [vmem:[%s1006_s2 + $0x20] sm:$0xff]   ;;  %v770_v13 = vld [vmem:[%s1006_s2 + $0x28] sm:$0xff]   ;;  %v772_v15 = vld [vmem:[%s1006_s2 + $0x38] sm:$0xff]   ;;  %v784_v32 = vmov 1966171168  }
   0x5   :  { %43 = vperm.xlu1 %764, %v40_v5   ;;  %719 = vmatprep.subr.bf16.mxu0 %v781_v4  ;;  %v775_v16 = vld [vmem:[%s1007_s3 + $0x4] ss:$8 sps:$4 sm:$0xff]   ;;  %v773_v23 = vld [vmem:[%s1007_s3] ss:$8 sps:$4 sm:$0xff]   ;;  %v778_v25 = vld [vmem:[%s1007_s3 + $0x14] ss:$8 sps:$4 sm:$0xff]   ;;  %v248_v33 = vunpack.c.l.s4 %v784_v32 }
   0x6   :  { %34 = vperm.xlu0 %763, %v25_v6   ;;  %v776_v26 = vld [vmem:[%s1007_s3 + $0x10] ss:$8 sps:$4 sm:$0xff]   ;;  %v674_v37 = vld [vmem:[%s1009_s4] ss:$0 sm:$0xff]  ;;  %v890_v52 = vsub.s32 0, %v251_v35 }
   0x7   :  { %v249_v34 = vunpack.c.0.s8 %v248_v33 }
   0x8   :  { %720 = vmatpush3.bf16.msra.mxu0 %v766_v9 }
   0x9   :  { %46 = vperm.xlu1 %764, %v41_v8   ;;  %721 = vmatprep.subr.bf16.mxu0 %v781_v4  ;;  %v252_v40 = vsub.s32 %v249_v34, %v251_v35 }
   0xc   :  { %722 = vmatpush3.bf16.msra.mxu0 %v767_v10 }
   0xd   :  { %723 = vmatprep.subr.bf16.mxu0 %v781_v4 }
  0x10   :  { %724 = vmatpush3.bf16.msra.mxu0 %v768_v11 }
  0x11   :  { %725 = vmatprep.subr.bf16.mxu0 %v781_v4 }
  0x14   :  { %726 = vmatpush3.bf16.msra.mxu0 %v769_v12 }
  0x15   :  { %727 = vmatprep.subr.bf16.mxu0 %v781_v4 }
  0x18   :  { %728 = vmatpush3.bf16.msra.mxu0 %v770_v13 }
  0x19   :  { %729 = vmatprep.subr.bf16.mxu0 %v781_v4 }
  0x1c   :  { %730 = vmatpush3.bf16.msra.mxu0 %v771_v14 }
  0x1d   :  { %731 = vmatprep.subr.bf16.mxu0 %v781_v4 }
  0x20   :  { %732 = vmatpush3.bf16.msra.mxu0 %v772_v15 }
  0x21   :  { %191 = vmatprep.subr.bf16.mxu0 %v775_v16 }
  0x81   :  { %v32_v19 = vpop.permute.xlu0 %31 }
  0x82   :  { %vm36_vm3 = vcmp.eq.s32.totalorder %v29_v18, %v32_v19 }
  0x84   :  { %v44_v20 = vpop.permute.xlu1 %43 }
  0x85   :  { %vm48_vm4 = vcmp.eq.s32.totalorder %v44_v20, 1  ;;  %v35_v21 = vpop.permute.xlu0 %34 }
  0x86   :  { %vm50_vm5 = vmand %vm36_vm3, %vm48_vm4  ;;  %vm37_vm6 = vcmp.eq.s32.totalorder %v29_v18, %v35_v21 }
  0x88   :  { %v47_v22 = vpop.permute.xlu1 %46 }
  0x89   :  { %vm49_vm7 = vcmp.eq.s32.totalorder %v47_v22, 1 }
  0x8a   :  { %vm51_vm8 = vmand %vm37_vm6, %vm49_vm7 }
  0x8b   :  { %vm667_vm9 = vmpackc.low %vm51_vm8, %vm50_vm5 }
  0x8c   :  { %734 = vmatmul.mubr.msk.bf16.vlgmr.msra.gmra.mrb[0].mxu0 %vm667_vm9, %v783_v24 }
  0x8d   :  { %192 = vmatpush1.bf16.msra.mxu0 %v773_v23  ;;  %223 = vmatprep.mubr.bf16.mxu0 %v780_v0 }
  0x8e   :  { %193 = vmatprep.subr.bf16.mxu0 %v778_v25 }
  0x91   :  { %194 = vmatpush1.bf16.msra.mxu0 %v776_v26 }
 0x15f   :  { %v155_v27 = vpop.f32.mrb[0].mxu0 }
 0x160   :  { %v735_v28 = vpop.f32.mrb[1].mxu0 }
 0x161   :  { %v158_v29 = vpop.f32.mrb[2].mxu0 }
 0x162   :  { %v162_v30 = vpack.c.bf16 %v158_v29, %v155_v27  ;;  %v736_v31 = vpop.f32.mrb[3].mxu0 }
 0x164   :  { %673 = vmatmul.mubr.msk.bf16.vlgmr.msra.gmra.mrb[4].mxu0 %vm187_vm10, %v162_v30 }
 0x237   :  { %v225_v36 = vpop.f32.mrb[4].mxu0 }
 0x238   :  { %v227_v38 = vpop.f32.mrb[5].mxu0  ;;  %v241_v41 = vadd.f32 %v674_v37, %v225_v36 }
 0x239   :  { %v229_v39 = vpop.f32.mrb[6].mxu0  ;;  %v892_v53 = vpack.c.bf16 %v227_v38, %v227_v38 }
 0x23a   :  { %v242_v42 = vadd.f32 %v674_v37, %v229_v39  ;;  %v231_v43 = vpop.f32.mrb[7].mxu0 }
 0x23b   :  { %v894_v54 = vpack.c.bf16 %v231_v43, %v231_v43 }
 0x23c   :  { %v243_v44 = vpack.c.bf16 %v242_v42, %v241_v41  ;;  %v675_v45 = vpack.c.bf16 %v242_v42, %v242_v42 }
 0x23e   :  { %v253_v46 = vrot.slane %v243_v44, %v252_v40  ;;  %v260_v47 = vrot.slane %v675_v45, %v252_v40 }
 0x240   :  { %v261_v48 = vcombine.high %v253_v46, %v253_v46  ;;  %v262_v49 = vcombine.high %v260_v47, %v260_v47  ;;  %v269_v50 = vrot.slane %v253_v46, %v252_v40  ;;  %v888_v51 = vrot.slane %v260_v47, %v252_v40 }
 0x242   :  { %v283_v55 = vrot.slane %v261_v48, %v252_v40  ;;  %v896_v56 = vrot.slane %v262_v49, %v252_v40  ;;  %v291_v57 = vcombine.high %v269_v50, %v269_v50  ;;  %v900_v58 = vcombine.high %v888_v51, %v888_v51 }
 0x243   :  { %v296_v59 = vunpack.i.h.s16 %v269_v50  ;;  %v304_v60 = vunpack.i.h.s16 %v888_v51  ;;  %v678_v61 = vpack.i.b16 %v269_v50, %v269_v50  ;;  %v682_v62 = vpack.i.b16 %v888_v51, %v888_v51 }
 0x244   :  { %v293_v63 = vcombine.high %v283_v55, %v283_v55  ;;  %v907_v1 = vcombine.high %v896_v56, %v896_v56  ;;  %v298_v2 = vunpack.i.h.s16 %v283_v55  ;;  %v300_v3 = vunpack.i.h.s16 %v291_v57 }
 0x245   :  { %v306_v5 = vunpack.i.h.s16 %v896_v56  ;;  %v308_v6 = vunpack.i.h.s16 %v900_v58  ;;  %v319_v7 = vpack.i.b16 %v296_v59, %v296_v59  ;;  %v679_v8 = vpack.i.b16 %v283_v55, %v283_v55 }
 0x246   :  { %v321_v9 = vpack.i.b16 %v298_v2, %v298_v2  ;;  %v680_v10 = vpack.i.b16 %v291_v57, %v291_v57  ;;  %v323_v11 = vpack.i.b16 %v300_v3, %v300_v3  ;;  %v327_v12 = vpack.i.b16 %v304_v60, %v304_v60 }
 0x247   :  { %v683_v13 = vpack.i.b16 %v896_v56, %v896_v56  ;;  %v329_v14 = vpack.i.b16 %v306_v5, %v306_v5  ;;  %v684_v15 = vpack.i.b16 %v900_v58, %v900_v58  ;;  %v331_v16 = vpack.i.b16 %v308_v6, %v308_v6 }
 0x248   :  { %v337_v17 = vrot.slane %v678_v61, %v890_v52  ;;  %v341_v18 = vrot.slane %v319_v7, %v890_v52  ;;  %v345_v19 = vrot.slane %v679_v8, %v890_v52  ;;  %v349_v20 = vrot.slane %v321_v9, %v890_v52 }
 0x249   :  { %v353_v21 = vrot.slane %v680_v10, %v890_v52  ;;  %v357_v22 = vrot.slane %v323_v11, %v890_v52  ;;  %v302_v23 = vunpack.i.h.s16 %v293_v63  ;;  %v681_v24 = vpack.i.b16 %v293_v63, %v293_v63 }
 0x24a   :  { %v399_v25 = vpack.i.b16 %v337_v17, %v337_v17  ;;  %v406_v26 = vpack.i.b16 %v341_v18, %v341_v18  ;;  %v413_v27 = vpack.i.b16 %v345_v19, %v345_v19  ;;  %v420_v28 = vpack.i.b16 %v349_v20, %v349_v20 }
 0x24b   :  { %v427_v29 = vpack.i.b16 %v353_v21, %v353_v21  ;;  %v434_v30 = vpack.i.b16 %v357_v22, %v357_v22  ;;  %v325_v31 = vpack.i.b16 %v302_v23, %v302_v23  ;;  %v361_v32 = vrot.slane %v681_v24, %v890_v52 }
 0x24c   :  { %v404_v33 = vrot.slane %v399_v25, %v890_v52  ;;  %v411_v34 = vrot.slane %v406_v26, %v890_v52  ;;  %v418_v35 = vrot.slane %v413_v27, %v890_v52  ;;  %v425_v36 = vrot.slane %v420_v28, %v890_v52 }
 0x24d   :  { %v432_v37 = vrot.slane %v427_v29, %v890_v52  ;;  %v439_v38 = vrot.slane %v434_v30, %v890_v52  ;;  %v365_v39 = vrot.slane %v325_v31, %v890_v52  ;;  %v441_v40 = vpack.i.b16 %v361_v32, %v361_v32 }
 0x24e   :  { %v510_v41 = vadd.bf16 %v892_v53, %v404_v33  ;;  %v511_v42 = vadd.bf16 %v892_v53, %v411_v34  ;;  %v512_v43 = vadd.bf16 %v892_v53, %v418_v35  ;;  %v513_v44 = vadd.bf16 %v892_v53, %v425_v36 }
 0x24f   :  { %v514_v45 = vadd.bf16 %v892_v53, %v432_v37  ;;  %v515_v46 = vadd.bf16 %v892_v53, %v439_v38  ;;  %v446_v47 = vrot.slane %v441_v40, %v890_v52  ;;  %v448_v48 = vpack.i.b16 %v365_v39, %v365_v39 }
 0x250   :  { %v526_v49 = vmax.bf16 %v780_v0, %v510_v41  ;;  %v527_v50 = vmax.bf16 %v780_v0, %v511_v42  ;;  %v528_v51 = vmax.bf16 %v780_v0, %v512_v43  ;;  %v529_v55 = vmax.bf16 %v780_v0, %v513_v44 }
 0x251   :  { %v530_v56 = vmax.bf16 %v780_v0, %v514_v45  ;;  %v531_v57 = vmax.bf16 %v780_v0, %v515_v46  ;;  %v453_v58 = vrot.slane %v448_v48, %v890_v52  ;;  %v516_v59 = vadd.bf16 %v892_v53, %v446_v47 }
 0x252   :  { %v687_v60 = vcombine.low %v526_v49, %v527_v50  ;;  %v688_v61 = vcombine.low %v528_v51, %v529_v55  ;;  %v369_v63 = vrot.slane %v682_v62, %v890_v52  ;;  %v373_v2 = vrot.slane %v327_v12, %v890_v52 }
 0x253   :  { %v689_v3 = vcombine.low %v530_v56, %v531_v57  ;;  %v517_v5 = vadd.bf16 %v892_v53, %v453_v58  ;;  %v532_v6 = vmax.bf16 %v780_v0, %v516_v59  ;;  %v377_v7 = vrot.slane %v683_v13, %v890_v52 }
 0x254   :  { %738 = vmatpush3.bf16.xpose.msra.mxu1 %v687_v60  ;;  %v455_v8 = vpack.i.b16 %v369_v63, %v369_v63  ;;  %v462_v9 = vpack.i.b16 %v373_v2, %v373_v2  ;;  %v381_v10 = vrot.slane %v329_v14, %v890_v52  ;;  %v385_v11 = vrot.slane %v684_v15, %v890_v52 }
 0x255   :  { %739 = vmatprep.subr.bf16.mxu1 %v781_v4  ;;  %v533_v62 = vmax.bf16 %v780_v0, %v517_v5  ;;  %v469_v17 = vpack.i.b16 %v377_v7, %v377_v7  ;;  %v389_v12 = vrot.slane %v331_v16, %v890_v52  ;;  %v310_v53 = vunpack.i.h.s16 %v907_v1 }
 0x256   :  { %v460_v18 = vrot.slane %v455_v8, %v890_v52  ;;  %v467_v13 = vrot.slane %v462_v9, %v890_v52  ;;  %v476_v19 = vpack.i.b16 %v381_v10, %v381_v10  ;;  %v483_v20 = vpack.i.b16 %v385_v11, %v385_v11 }
 0x257   :  { %v690_v21 = vcombine.low %v532_v6, %v533_v62  ;;  %v474_v14 = vrot.slane %v469_v17, %v890_v52  ;;  %v490_v22 = vpack.i.b16 %v389_v12, %v389_v12  ;;  %v685_v15 = vpack.i.b16 %v907_v1, %v907_v1 }
 0x258   :  { %v518_v23 = vadd.bf16 %v894_v54, %v460_v18  ;;  %v519_v24 = vadd.bf16 %v894_v54, %v467_v13  ;;  %v481_v16 = vrot.slane %v476_v19, %v890_v52  ;;  %v488_v25 = vrot.slane %v483_v20, %v890_v52 }
 0x259   :  { %v520_v26 = vadd.bf16 %v894_v54, %v474_v14  ;;  %v495_v27 = vrot.slane %v490_v22, %v890_v52  ;;  %v333_v28 = vpack.i.b16 %v310_v53, %v310_v53  ;;  %v393_v29 = vrot.slane %v685_v15, %v890_v52 }
 0x25a   :  { %v534_v30 = vmax.bf16 %v780_v0, %v518_v23  ;;  %v535_v31 = vmax.bf16 %v780_v0, %v519_v24  ;;  %v521_v1 = vadd.bf16 %v894_v54, %v481_v16  ;;  %v522_v32 = vadd.bf16 %v894_v54, %v488_v25 }
 0x25b   :  { %v523_v33 = vadd.bf16 %v894_v54, %v495_v27  ;;  %v397_v34 = vrot.slane %v333_v28, %v890_v52  ;;  %v497_v35 = vpack.i.b16 %v393_v29, %v393_v29  ;;  %v536_v37 = vmax.bf16 %v780_v0, %v520_v26 }
 0x25c   :  { %740 = vmatpush3.bf16.xpose.msra.mxu1 %v688_v61  ;;  %v691_v36 = vcombine.low %v534_v30, %v535_v31  ;;  %v537_v38 = vmax.bf16 %v780_v0, %v521_v1  ;;  %v538_v39 = vmax.bf16 %v780_v0, %v522_v32 }
 0x25d   :  { %741 = vmatprep.subr.bf16.mxu1 %v781_v4  ;;  %v539_v40 = vmax.bf16 %v780_v0, %v523_v33  ;;  %v502_v41 = vrot.slane %v497_v35, %v890_v52  ;;  %v504_v42 = vpack.i.b16 %v397_v34, %v397_v34 }
 0x25e   :  { %v692_v43 = vcombine.low %v536_v37, %v537_v38 }
 0x25f   :  { %v693_v44 = vcombine.low %v538_v39, %v539_v40  ;;  %v509_v45 = vrot.slane %v504_v42, %v890_v52  ;;  %v524_v46 = vadd.bf16 %v894_v54, %v502_v41 }
 0x261   :  { %v525_v47 = vadd.bf16 %v894_v54, %v509_v45  ;;  %v540_v48 = vmax.bf16 %v780_v0, %v524_v46 }
 0x263   :  { %v541_v49 = vmax.bf16 %v780_v0, %v525_v47  ;;  %v779_v0 = vld [vmem:[%s1008_s5] sm:$0xff]  }
 0x264   :  { %742 = vmatpush3.bf16.xpose.msra.mxu1 %v689_v3 }
 0x265   :  { %743 = vmatprep.subr.bf16.mxu1 %v781_v4  ;;  %v694_v50 = vcombine.low %v540_v48, %v541_v49 }
 0x26c   :  { %744 = vmatpush3.bf16.xpose.msra.mxu1 %v690_v21 }
 0x26d   :  { %745 = vmatprep.subr.bf16.mxu1 %v781_v4 }
 0x274   :  { %746 = vmatpush3.bf16.xpose.msra.mxu1 %v691_v36 }
 0x275   :  { %747 = vmatprep.subr.bf16.mxu1 %v781_v4 }
 0x27c   :  { %748 = vmatpush3.bf16.xpose.msra.mxu1 %v692_v43 }
 0x27d   :  { %749 = vmatprep.subr.bf16.mxu1 %v781_v4 }
 0x284   :  { %750 = vmatpush3.bf16.xpose.msra.mxu1 %v693_v44 }
 0x285   :  { %751 = vmatprep.subr.bf16.mxu1 %v781_v4 }
 0x28c   :  { %752 = vmatpush3.bf16.xpose.msra.mxu1 %v694_v50 }
 0x293   :  { %754 = vmatmul.mubr.bf16.vlgmr.msra.gmra.mrb[0].mxu1 %v779_v0 }
 0x366   :  { %v632_v52 = vpop.f32.mrb[0].mxu1 }
 0x367   :  { %640 = vst.msk [vmem:[%s1010_s6] sm:$0xff] %vm639_vm11, %v632_v52  ;;  %644 = vrot.lane.b32.xlu0 %v632_v52, %s785_s30  ;;  %v755_v54 = vpop.f32.mrb[1].mxu1 }
 0x368   :  { %v635_v51 = vpop.f32.mrb[2].mxu1 }
 0x369   :  { %641 = vst.msk [vmem:[%s1010_s6 + $0x8] sm:$0xff] %vm639_vm11, %v635_v51  ;;  %646 = vrot.lane.b32.xlu1 %v635_v51, %s785_s30  ;;  %v756_v4 = vpop.f32.mrb[3].mxu1 }
 0x3d9   :  { %v645_v55 = vpop.permute.xlu0 %644 }
 0x3da   :  { %695 = vst.msk [vmem:[%s1010_s6 + $0x10] sm:$0xff] %vm639_vm11, %v645_v55 }
 0x3db   :  { %v647_v56 = vpop.permute.xlu1 %646 }
 0x3dc   :  { %696 = vst.msk [vmem:[%s1010_s6 + $0x18] sm:$0xff] %vm639_vm11, %v647_v56 }

</bundles_post_ra>
